<compile_context>
chip_gen: v5e
topology: v5e:2x2
jax: 0.10.0
libtpu: 0.0.40
codegen_flags: <defaults>
</compile_context>

<pallas_src>
import functools

import jax
import jax.numpy as jnp
from jax import lax
from jax.experimental import pallas as pl
from jax.experimental.pallas import tpu as pltpu


def mlp_matvec_kernel(w_eff_ref, x_ref, o_ref):
    # o^T tile (1, TM) = w_eff (1, D) contracted with x tile (TM, D) over D.
    # Contraction dims ((1,), (1,)) == "rhs transposed" matmul: no VMEM
    # transpose is materialized and the (1, TM) result is lane-dense.
    o_ref[...] = lax.dot_general(
        w_eff_ref[...],
        x_ref[...],
        dimension_numbers=(((1,), (1,)), ((), ())),
        preferred_element_type=jnp.float32,
    )


def _choose_row_tile(n, d, itemsize=4, budget_bytes=8 * 1024 * 1024):
    """Largest row tile whose double-buffered x slab fits the VMEM budget."""
    if 2 * n * d * itemsize <= budget_bytes:
        # Whole batch in one block (block == full dims satisfies (8,128) rule).
        return n
    tm = budget_bytes // (2 * d * itemsize)
    tm = max(128, (tm // 128) * 128)  # lane/sublane aligned when tiling
    return min(tm, 2048)


@functools.partial(jax.jit, static_argnames=())
def mlp_forward(x, w1, w2):
    N, D = x.shape
    assert w1.shape == (D, D)
    assert w2.shape == (1, D)

    # One-time fusion of the two bias-free linears:
    #   (x @ W1^T) @ W2^T == x @ (W2 @ W1)^T
    w_eff = jnp.dot(w2, w1, preferred_element_type=jnp.float32)  # (1, D)
    x = x.astype(jnp.float32)

    tm = _choose_row_tile(N, D)
    grid = (pl.cdiv(N, tm),)

    out_t = pl.pallas_call(
        mlp_matvec_kernel,
        out_shape=jax.ShapeDtypeStruct((1, N), jnp.float32),
        grid_spec=pl.GridSpec(
            grid=grid,
            in_specs=[
                # w_eff: constant index_map -> stays resident in VMEM.
                pl.BlockSpec((1, D), lambda i: (0, 0)),
                # x: tiled over rows, double-buffered by the Pallas pipeline.
                pl.BlockSpec((tm, D), lambda i: (i, 0)),
            ],
            # Lane-dense output: batch on the 128-lane axis.
            out_specs=pl.BlockSpec((1, tm), lambda i: (0, i)),
        ),
        compiler_params=pltpu.CompilerParams(
            dimension_semantics=("parallel",),
            vmem_limit_bytes=64 * 1024 * 1024,
        ),
    )(w_eff, x)

    # Back to the PyTorch nn.Linear output layout (N, 1); this reshape is a
    # no-op on the row-major buffer.
    return out_t.reshape(N, 1)


if __name__ == "__main__":
    # Small shapes implied by the module: xs is (batch, features).
    N, D = 8, 32
    param_scaling = 1.0

    key = jax.random.PRNGKey(0)
    kx, k1, k2 = jax.random.split(key, 3)

    x = jax.random.normal(kx, (N, D), dtype=jnp.float32)

    # Deterministic init mimicking nn.Linear default (uniform in +-1/sqrt(in)),
    # then scaled by param_scaling as in __init__.
    bound = 1.0 / jnp.sqrt(jnp.float32(D))
    w1 = jax.random.uniform(k1, (D, D), jnp.float32, -bound, bound) * param_scaling
    w2 = jax.random.uniform(k2, (1, D), jnp.float32, -bound, bound) * param_scaling

    out = jax.block_until_ready(mlp_forward(x, w1, w2))

    # Reference check in plain JAX (unfused order, matching the PyTorch module).
    ref = (x @ w1.T) @ w2.T
    assert out.shape == (N, 1)
    assert jnp.allclose(out, ref, atol=1e-5, rtol=1e-5)

    print("KERNEL_OK")
</pallas_src>

<mosaic_0001>
module attributes {stable_mosaic.version = 11 : i64} {
  func.func @mlp_matvec_kernel(%arg0: i32, %arg1: memref<1x32xf32, #tpu.memory_space<vmem>>, %arg2: memref<8x32xf32, #tpu.memory_space<vmem>>, %arg3: memref<1x8xf32, #tpu.memory_space<vmem>>) attributes {dimension_semantics = [#tpu.dimension_semantics<parallel>], iteration_bounds = array<i64: 1>, scalar_prefetch = 0 : i64, scratch_operands = 0 : i64, tpu.core_type = #tpu.core_type<tc>, window_params = [{pipeline_mode = #tpu.pipeline_mode<synchronous>, transform_indices = @transform_0, window_bounds = array<i64: 1, 32>}, {transform_indices = @transform_1, window_bounds = array<i64: 8, 32>}, {transform_indices = @transform_2, window_bounds = array<i64: 1, 8>}]} {
    %c0 = arith.constant 0 : index
    %c0_0 = arith.constant 0 : index
    %0 = vector.load %arg1[%c0, %c0_0] : memref<1x32xf32, #tpu.memory_space<vmem>>, vector<1x32xf32>
    %c0_1 = arith.constant 0 : index
    %c0_2 = arith.constant 0 : index
    %1 = vector.load %arg2[%c0_1, %c0_2] : memref<8x32xf32, #tpu.memory_space<vmem>>, vector<8x32xf32>
    %cst = arith.constant dense<0.000000e+00> : vector<1x8xf32>
    %2 = tpu.matmul %0, %1, %cst {dimension_numbers = #tpu.dot_dimension_numbers<[1], [1], [0], [0], [0, 0, 1, 0], [], []>} : vector<1x32xf32>, vector<8x32xf32>, vector<1x8xf32> -> vector<1x8xf32>
    %c0_3 = arith.constant 0 : index
    %c0_4 = arith.constant 0 : index
    %3 = vector.load %arg3[%c0_3, %c0_4] : memref<1x8xf32, #tpu.memory_space<vmem>>, vector<1x8xf32>
    tpu.vector_store %arg3[%c0_3, %c0_4], %2 {strides = array<i32>} : memref<1x8xf32, #tpu.memory_space<vmem>>, vector<1x8xf32>,
    return
  }
  func.func @transform_0(%arg0: i32) -> (i32, i32) {
    %c0_i32 = arith.constant 0 : i32
    %c0_i32_0 = arith.constant 0 : i32
    %c0_i32_1 = arith.constant 0 : i32
    return %c0_i32, %c0_i32_0 : i32, i32
  }
  func.func @transform_1(%arg0: i32) -> (i32, i32) {
    %c0_i32 = arith.constant 0 : i32
    %c0_i32_0 = arith.constant 0 : i32
    return %arg0, %c0_i32 : i32, i32
  }
  func.func @transform_2(%arg0: i32) -> (i32, i32) {
    %c0_i32 = arith.constant 0 : i32
    %c0_i32_0 = arith.constant 0 : i32
    return %c0_i32, %arg0 : i32, i32
  }
}

</mosaic_0001>

<bundles_post_ra>
// kernel: mlp_forward.1
= control target key start
LH: loop header
LB: loop body
LE: loop exit
PB: predicated region body
PF: predicated region fallthrough
CT: control target
= control target key end

     0   :  { %vm14_vm0 = vcmask 261120   ;;  %s113_s0 = inlined_call_operand.vmem [shape: f32[1,32], index: 0, kind: input, shape index: {}]   ;;  %s114_s1 = inlined_call_operand.vmem [shape: f32[8,32], index: 1, kind: input, shape index: {}]   ;;  %s115_s2 = inlined_call_operand.hbm [shape: f32[1,8], index: 2, kind: output, shape index: {}]  }
   0x1   :  { %v13_v0 = vld [vmem:[%s114_s1] sm:$0xff] }
   0x2   :  { %7 = vsyncpa [#allocation3], 0  ;;  %59 = vmatpush.xpose.msk.msra.mxu0 %vm14_vm0, %v13_v0  ;;  %v12_v1 = vld [vmem:[%s113_s0] sm:$0x1]  ;;  %s88_s13 = smov [#allocation2]   ;;  %s50_s17 = sshll.u32 %s115_s2, 4  ;;  %s51_s17 = int_to_ptr.hbm [resolvable:$true] %s50_s17 }
   0x3   :  { %s48_s14 = sshll.u32 %s88_s13, 4  ;;  %vm41_vm1 = vcmask 57344   ;;  %s49_s14 = int_to_ptr.vmem [resolvable:$true] %s48_s14 }
   0x5   :  { %60 = vmatmul.msk.f32.vlgmr.msra.gmra.mxu0 %vm14_vm0, %v12_v1 }
  0x82   :  { %v38_v2 = vpop.f32.mrf.mxu0 }
  0x83   :  { %42 = vst.msk [vmem:[#allocation2] sm:$0x1] %vm41_vm1, %v38_v2 }
  0x84   :  { %53 = dma.vmem_to_hbm [thread:$0]  %s49_s14, 16, %s51_s17, [#allocation3]  }
  0x85   :  { %86 = dma.done.wait [#allocation3], 16  }
  0x86   :  { %87 = vsyncadd [#allocation3], 4294967280 }
  0x87   :  { %58 = vsyncpa [#allocation3], 1 }

</bundles_post_ra>
